<compile_context>
chip_gen: v7x
topology: tpu7x:2x2x1
jax: 0.10.0
libtpu: 0.0.40
codegen_flags: <defaults>
</compile_context>

<pallas_src>
import jax
import jax.numpy as jnp
from jax import lax
from jax.experimental import pallas as pl
from jax.experimental.pallas import tpu as pltpu

UNIFIED_DIM = 64
SEM_THRESHOLD = 0.3
INTERACTION_COEF = 0.7
BALANCE_COEF = 0.1
ROUTER_Z_COEF = 0.01

# MXU operands are cast to bf16 (f32 accumulation): the fast path on v6e/v7x,
# harmless on v5e (elementwise math stays f32).  Set to jnp.float32 for
# bit-exact f32 matmuls.
MXU_DTYPE = jnp.bfloat16


def _silu(x):
    return x * jax.nn.sigmoid(x)


def interaction_kernel(e_t_ref, e_i_ref, m_t_ref, m_i_ref,
                       aw1_ref, ab1_ref, aw2_ref, ab2_ref,
                       gw1_ref, gb1_ref, gw2_ref, gb2_ref,
                       mask_ref, loss_ref):
    B = e_t_ref.shape[0]
    Bf = float(B)

    e_t = e_t_ref[...]
    e_i = e_i_ref[...]
    m_t = m_t_ref[...]
    m_i = m_i_ref[...]

    # ---- CLIP-style cosine similarity between m_t and m_i ------------------
    # rsqrt runs on the EUP slot; the tiny clamp only guards an all-zero row
    # (the torch reference divides by the raw norm).
    t_n = m_t * lax.rsqrt(jnp.maximum(jnp.sum(m_t * m_t, axis=-1, keepdims=True), 1e-12))
    i_n = m_i * lax.rsqrt(jnp.maximum(jnp.sum(m_i * m_i, axis=-1, keepdims=True), 1e-12))
    clip_score = jnp.sum(t_n * i_n, axis=-1, keepdims=True)              # (B, 1)
    sem_gate = clip_score > SEM_THRESHOLD                                # CE targets

    # ---- TokenAttention over stacked modalities (e_t, e_i, m_t, m_i) -------
    # All four modalities fused along the sublane axis -> single MXU matmul.
    stacked = jnp.concatenate([e_t, e_i, m_t, m_i], axis=0)              # (4B, 64)
    aw1 = aw1_ref[...].astype(MXU_DTYPE)
    h = _silu(jnp.dot(stacked.astype(MXU_DTYPE), aw1,
                      preferred_element_type=jnp.float32) + ab1_ref[...])  # (4B, 64)
    # Second projection (out_dim = 1): VPU multiply + lane reduction instead of
    # an N=1 MXU matmul.
    scores = jnp.sum(h * aw2_ref[...], axis=-1, keepdims=True) + ab2_ref[0]  # (4B, 1)

    # matmul(scores[B,1,4], stacked[B,4,64]) == score-weighted sum over modalities
    weighted = scores * stacked                                          # (4B, 64)
    gate_inputs = (weighted[0:B, :] + weighted[B:2 * B, :]
                   + weighted[2 * B:3 * B, :] + weighted[3 * B:4 * B, :])  # (B, 64)

    # ---- soft gate MLP -> logits (B, 2) -------------------------------------
    gw1 = gw1_ref[...].astype(MXU_DTYPE)
    h2 = _silu(jnp.dot(gate_inputs.astype(MXU_DTYPE), gw1,
                       preferred_element_type=jnp.float32) + gb1_ref[...])  # (B, 64)
    gw2 = gw2_ref[...]                                                    # (2, 64), torch (out,in) layout
    l0 = jnp.sum(h2 * gw2[0:1, :], axis=-1, keepdims=True) + gb2_ref[0]   # (B, 1)
    l1 = jnp.sum(h2 * gw2[1:2, :], axis=-1, keepdims=True) + gb2_ref[1]   # (B, 1)

    lmax = jnp.maximum(l0, l1)
    lse = lmax + jnp.log(jnp.exp(l0 - lmax) + jnp.exp(l1 - lmax))         # (B, 1)

    # CrossEntropyLoss(gate_logits, sem_gate), mean reduction, coef 0.7
    picked = jnp.where(sem_gate, l1, l0)
    interaction_loss = INTERACTION_COEF * jnp.sum(lse - picked) / Bf

    # router-z loss: coefficient applied twice (inside the helper and outside),
    # exactly as in the reference module.
    router_z_loss = (ROUTER_Z_COEF * ROUTER_Z_COEF) * jnp.sum(lse * lse) / Bf

    # balance loss over argmax dispatch (2 experts, MSE vs uniform 0.5)
    n1 = jnp.sum((l1 > l0).astype(jnp.float32))
    d1 = n1 / Bf
    d0 = 1.0 - d1
    balance_loss = BALANCE_COEF * 0.5 * ((d0 - 0.5) ** 2 + (d1 - 0.5) ** 2)

    loss_ref[0] = interaction_loss + router_z_loss + balance_loss         # scalar -> SMEM

    # expert mask: softmax probs, each column repeated twice -> (B, 4)
    p0 = jnp.exp(l0 - lse)
    p1 = jnp.exp(l1 - lse)
    col = lax.broadcasted_iota(jnp.int32, (B, 4), 1)
    mask_ref[...] = jnp.where(col < 2, p0, p1)


def make_params(key):
    """Deterministic Linear params.

    aw1/gw1 are stored (in, out) so the kernel computes x @ W + b; the small
    output projections aw2 (1,64) / gw2 (2,64) stay in torch's (out, in)
    layout because the kernel consumes them row-wise on the VPU.
    """
    d = UNIFIED_DIM
    ks = jax.random.split(key, 8)
    s = 1.0 / jnp.sqrt(jnp.float32(d))
    u = lambda k, shape: jax.random.uniform(k, shape, jnp.float32, -s, s)
    return (
        u(ks[0], (d, d)), u(ks[1], (1, d)),   # TokenAttention Linear(64,64)
        u(ks[2], (1, d)), u(ks[3], (1,)),     # TokenAttention Linear(64,1)
        u(ks[4], (d, d)), u(ks[5], (1, d)),   # soft_gate Linear(64,64)
        u(ks[6], (2, d)), u(ks[7], (2,)),     # soft_gate Linear(64,2)
    )


@jax.jit
def interaction_module(p_t, p_i, e_t, e_i, m_t, m_i, params):
    # p_t / p_i only feed the JSD -> agr_gate branch, which is dead code w.r.t.
    # the module's returned (expert_mask, gate_loss); it is elided entirely.
    del p_t, p_i
    aw1, ab1, aw2, ab2, gw1, gb1, gw2, gb2 = params
    B = e_t.shape[0]
    vmem = pl.BlockSpec(memory_space=pltpu.MemorySpace.VMEM)
    smem = pl.BlockSpec(memory_space=pltpu.MemorySpace.SMEM)
    out_shapes = (
        jax.ShapeDtypeStruct((B, 4), jnp.float32),   # expert_mask
        jax.ShapeDtypeStruct((1,), jnp.float32),     # gate_loss (scalar in SMEM)
    )
    # TODO(synk): for large B, add a batch grid with dimension_semantics=("parallel",)
    # (needed sooner on v7x: 2 TensorCores, 64 MiB VMEM) and reduce the per-tile
    # partial losses outside the kernel.
    mask, loss = pl.pallas_call(
        interaction_kernel,
        out_shape=out_shapes,
        in_specs=[vmem, vmem, vmem, vmem,      # e_t, e_i, m_t, m_i
                  vmem, vmem, vmem, smem,      # aw1, ab1, aw2, ab2
                  vmem, vmem, vmem, smem],     # gw1, gb1, gw2, gb2
        out_specs=(vmem, smem),
    )(e_t, e_i, m_t, m_i, aw1, ab1, aw2, ab2, gw1, gb1, gw2, gb2)
    return mask, loss[0]


if __name__ == "__main__":
    key = jax.random.PRNGKey(0)
    kp, kin = jax.random.split(key)
    params = make_params(kp)

    B, C, D = 8, 16, UNIFIED_DIM
    k1, k2, k3, k4, k5, k6 = jax.random.split(kin, 6)
    p_t = jax.nn.softmax(jax.random.normal(k1, (B, C)), axis=-1)
    p_i = jax.nn.softmax(jax.random.normal(k2, (B, C)), axis=-1)
    e_t = jax.random.normal(k3, (B, D), jnp.float32)
    e_i = jax.random.normal(k4, (B, D), jnp.float32)
    m_t = jax.random.normal(k5, (B, D), jnp.float32)
    m_i = jax.random.normal(k6, (B, D), jnp.float32)

    expert_mask, gate_loss = interaction_module(p_t, p_i, e_t, e_i, m_t, m_i, params)
    jax.block_until_ready((expert_mask, gate_loss))
    assert expert_mask.shape == (B, 4)
    assert gate_loss.shape == ()
    print("KERNEL_OK")
</pallas_src>

<mosaic_0001>
module attributes {stable_mosaic.version = 11 : i64} {
  func.func @interaction_kernel(%arg0: memref<8x64xf32, #tpu.memory_space<vmem>>, %arg1: memref<8x64xf32, #tpu.memory_space<vmem>>, %arg2: memref<8x64xf32, #tpu.memory_space<vmem>>, %arg3: memref<8x64xf32, #tpu.memory_space<vmem>>, %arg4: memref<64x64xf32, #tpu.memory_space<vmem>>, %arg5: memref<1x64xf32, #tpu.memory_space<vmem>>, %arg6: memref<1x64xf32, #tpu.memory_space<vmem>>, %arg7: memref<1xf32, #tpu.memory_space<smem>>, %arg8: memref<64x64xf32, #tpu.memory_space<vmem>>, %arg9: memref<1x64xf32, #tpu.memory_space<vmem>>, %arg10: memref<2x64xf32, #tpu.memory_space<vmem>>, %arg11: memref<2xf32, #tpu.memory_space<smem>>, %arg12: memref<8x4xf32, #tpu.memory_space<vmem>>, %arg13: memref<1xf32, #tpu.memory_space<smem>>) attributes {dimension_semantics = [], scalar_prefetch = 0 : i64, scratch_operands = 0 : i64, tpu.core_type = #tpu.core_type<tc>} {
    %c0 = arith.constant 0 : index
    %c0_0 = arith.constant 0 : index
    %0 = vector.load %arg0[%c0, %c0_0] : memref<8x64xf32, #tpu.memory_space<vmem>>, vector<8x64xf32>
    %c0_1 = arith.constant 0 : index
    %c0_2 = arith.constant 0 : index
    %1 = vector.load %arg1[%c0_1, %c0_2] : memref<8x64xf32, #tpu.memory_space<vmem>>, vector<8x64xf32>
    %c0_3 = arith.constant 0 : index
    %c0_4 = arith.constant 0 : index
    %2 = vector.load %arg2[%c0_3, %c0_4] : memref<8x64xf32, #tpu.memory_space<vmem>>, vector<8x64xf32>
    %c0_5 = arith.constant 0 : index
    %c0_6 = arith.constant 0 : index
    %3 = vector.load %arg3[%c0_5, %c0_6] : memref<8x64xf32, #tpu.memory_space<vmem>>, vector<8x64xf32>
    %4 = arith.mulf %2, %2 : vector<8x64xf32>
    %cst = arith.constant dense<0.000000e+00> : vector<8xf32>
    %5 = vector.multi_reduction <add>, %4, %cst [1] : vector<8x64xf32> to vector<8xf32>
    %6 = vector.shape_cast %5 : vector<8xf32> to vector<8x1xf32>
    %cst_7 = arith.constant 9.99999996E-13 : f32
    %7 = vector.broadcast %cst_7 : f32 to vector<8x1xf32>
    %8 = arith.maximumf %6, %7 : vector<8x1xf32>
    %9 = math.rsqrt %8 : vector<8x1xf32>
    %10 = vector.broadcast %9 : vector<8x1xf32> to vector<8x64xf32>
    %11 = arith.mulf %2, %10 : vector<8x64xf32>
    %12 = arith.mulf %3, %3 : vector<8x64xf32>
    %cst_8 = arith.constant dense<0.000000e+00> : vector<8xf32>
    %13 = vector.multi_reduction <add>, %12, %cst_8 [1] : vector<8x64xf32> to vector<8xf32>
    %14 = vector.shape_cast %13 : vector<8xf32> to vector<8x1xf32>
    %cst_9 = arith.constant 9.99999996E-13 : f32
    %15 = vector.broadcast %cst_9 : f32 to vector<8x1xf32>
    %16 = arith.maximumf %14, %15 : vector<8x1xf32>
    %17 = math.rsqrt %16 : vector<8x1xf32>
    %18 = vector.broadcast %17 : vector<8x1xf32> to vector<8x64xf32>
    %19 = arith.mulf %3, %18 : vector<8x64xf32>
    %20 = arith.mulf %11, %19 : vector<8x64xf32>
    %cst_10 = arith.constant dense<0.000000e+00> : vector<8xf32>
    %21 = vector.multi_reduction <add>, %20, %cst_10 [1] : vector<8x64xf32> to vector<8xf32>
    %22 = vector.shape_cast %21 : vector<8xf32> to vector<8x1xf32>
    %cst_11 = arith.constant 3.000000e-01 : f32
    %23 = vector.broadcast %cst_11 : f32 to vector<8x1xf32>
    %24 = arith.cmpf ogt, %22, %23 : vector<8x1xf32>
    %25 = tpu.concatenate %0, %1, %2, %3 in 0 : vector<8x64xf32>, vector<8x64xf32>, vector<8x64xf32>, vector<8x64xf32> -> vector<32x64xf32>
    %c0_12 = arith.constant 0 : index
    %c0_13 = arith.constant 0 : index
    %26 = vector.load %arg4[%c0_12, %c0_13] : memref<64x64xf32, #tpu.memory_space<vmem>>, vector<64x64xf32>
    %27 = arith.truncf %26 : vector<64x64xf32> to vector<64x64xbf16>
    %28 = arith.truncf %25 : vector<32x64xf32> to vector<32x64xbf16>
    %cst_14 = arith.constant dense<0.000000e+00> : vector<32x64xf32>
    %29 = tpu.matmul %28, %27, %cst_14 {dimension_numbers = #tpu.dot_dimension_numbers<[1], [0], [0], [1], [0, 0, 1, 1], [], []>} : vector<32x64xbf16>, vector<64x64xbf16>, vector<32x64xf32> -> vector<32x64xf32>
    %c0_15 = arith.constant 0 : index
    %c0_16 = arith.constant 0 : index
    %30 = vector.load %arg5[%c0_15, %c0_16] : memref<1x64xf32, #tpu.memory_space<vmem>>, vector<1x64xf32>
    %31 = vector.broadcast %30 : vector<1x64xf32> to vector<32x64xf32>
    %32 = arith.addf %29, %31 : vector<32x64xf32>
    %33 = arith.negf %32 : vector<32x64xf32>
    %34 = math.exp %33 : vector<32x64xf32>
    %cst_17 = arith.constant 1.000000e+00 : f32
    %35 = vector.broadcast %cst_17 : f32 to vector<32x64xf32>
    %36 = arith.addf %35, %34 : vector<32x64xf32>
    %37 = arith.divf %35, %36 : vector<32x64xf32>
    %38 = arith.mulf %32, %37 : vector<32x64xf32>
    %c0_18 = arith.constant 0 : index
    %c0_19 = arith.constant 0 : index
    %39 = vector.load %arg6[%c0_18, %c0_19] : memref<1x64xf32, #tpu.memory_space<vmem>>, vector<1x64xf32>
    %40 = vector.broadcast %39 : vector<1x64xf32> to vector<32x64xf32>
    %41 = arith.mulf %38, %40 : vector<32x64xf32>
    %cst_20 = arith.constant dense<0.000000e+00> : vector<32xf32>
    %42 = vector.multi_reduction <add>, %41, %cst_20 [1] : vector<32x64xf32> to vector<32xf32>
    %43 = vector.shape_cast %42 : vector<32xf32> to vector<32x1xf32>
    %c0_21 = arith.constant 0 : index
    %44 = memref.load %arg7[%c0_21] : memref<1xf32, #tpu.memory_space<smem>>
    %45 = vector.broadcast %44 : f32 to vector<32x1xf32>
    %46 = arith.addf %43, %45 : vector<32x1xf32>
    %47 = vector.broadcast %46 : vector<32x1xf32> to vector<32x64xf32>
    %48 = arith.mulf %47, %25 : vector<32x64xf32>
    %49 = vector.extract_strided_slice %48 {offsets = [0, 0], sizes = [8, 64], strides = [1, 1]} : vector<32x64xf32> to vector<8x64xf32>
    %50 = vector.extract_strided_slice %48 {offsets = [8, 0], sizes = [8, 64], strides = [1, 1]} : vector<32x64xf32> to vector<8x64xf32>
    %51 = arith.addf %49, %50 : vector<8x64xf32>
    %52 = vector.extract_strided_slice %48 {offsets = [16, 0], sizes = [8, 64], strides = [1, 1]} : vector<32x64xf32> to vector<8x64xf32>
    %53 = arith.addf %51, %52 : vector<8x64xf32>
    %54 = vector.extract_strided_slice %48 {offsets = [24, 0], sizes = [8, 64], strides = [1, 1]} : vector<32x64xf32> to vector<8x64xf32>
    %55 = arith.addf %53, %54 : vector<8x64xf32>
    %c0_22 = arith.constant 0 : index
    %c0_23 = arith.constant 0 : index
    %56 = vector.load %arg8[%c0_22, %c0_23] : memref<64x64xf32, #tpu.memory_space<vmem>>, vector<64x64xf32>
    %57 = arith.truncf %56 : vector<64x64xf32> to vector<64x64xbf16>
    %58 = arith.truncf %55 : vector<8x64xf32> to vector<8x64xbf16>
    %cst_24 = arith.constant dense<0.000000e+00> : vector<8x64xf32>
    %59 = tpu.matmul %58, %57, %cst_24 {dimension_numbers = #tpu.dot_dimension_numbers<[1], [0], [0], [1], [0, 0, 1, 1], [], []>} : vector<8x64xbf16>, vector<64x64xbf16>, vector<8x64xf32> -> vector<8x64xf32>
    %c0_25 = arith.constant 0 : index
    %c0_26 = arith.constant 0 : index
    %60 = vector.load %arg9[%c0_25, %c0_26] : memref<1x64xf32, #tpu.memory_space<vmem>>, vector<1x64xf32>
    %61 = vector.broadcast %60 : vector<1x64xf32> to vector<8x64xf32>
    %62 = arith.addf %59, %61 : vector<8x64xf32>
    %63 = arith.negf %62 : vector<8x64xf32>
    %64 = math.exp %63 : vector<8x64xf32>
    %cst_27 = arith.constant 1.000000e+00 : f32
    %65 = vector.broadcast %cst_27 : f32 to vector<8x64xf32>
    %66 = arith.addf %65, %64 : vector<8x64xf32>
    %67 = arith.divf %65, %66 : vector<8x64xf32>
    %68 = arith.mulf %62, %67 : vector<8x64xf32>
    %c0_28 = arith.constant 0 : index
    %c0_29 = arith.constant 0 : index
    %69 = vector.load %arg10[%c0_28, %c0_29] : memref<2x64xf32, #tpu.memory_space<vmem>>, vector<2x64xf32>
    %70 = vector.extract_strided_slice %69 {offsets = [0, 0], sizes = [1, 64], strides = [1, 1]} : vector<2x64xf32> to vector<1x64xf32>
    %71 = vector.broadcast %70 : vector<1x64xf32> to vector<8x64xf32>
    %72 = arith.mulf %68, %71 : vector<8x64xf32>
    %cst_30 = arith.constant dense<0.000000e+00> : vector<8xf32>
    %73 = vector.multi_reduction <add>, %72, %cst_30 [1] : vector<8x64xf32> to vector<8xf32>
    %74 = vector.shape_cast %73 : vector<8xf32> to vector<8x1xf32>
    %c0_31 = arith.constant 0 : index
    %75 = memref.load %arg11[%c0_31] : memref<2xf32, #tpu.memory_space<smem>>
    %76 = vector.broadcast %75 : f32 to vector<8x1xf32>
    %77 = arith.addf %74, %76 : vector<8x1xf32>
    %78 = vector.extract_strided_slice %69 {offsets = [1, 0], sizes = [1, 64], strides = [1, 1]} : vector<2x64xf32> to vector<1x64xf32>
    %79 = vector.broadcast %78 : vector<1x64xf32> to vector<8x64xf32>
    %80 = arith.mulf %68, %79 : vector<8x64xf32>
    %cst_32 = arith.constant dense<0.000000e+00> : vector<8xf32>
    %81 = vector.multi_reduction <add>, %80, %cst_32 [1] : vector<8x64xf32> to vector<8xf32>
    %82 = vector.shape_cast %81 : vector<8xf32> to vector<8x1xf32>
    %c1 = arith.constant 1 : index
    %83 = memref.load %arg11[%c1] : memref<2xf32, #tpu.memory_space<smem>>
    %84 = vector.broadcast %83 : f32 to vector<8x1xf32>
    %85 = arith.addf %82, %84 : vector<8x1xf32>
    %86 = arith.maximumf %77, %85 : vector<8x1xf32>
    %87 = arith.subf %77, %86 : vector<8x1xf32>
    %88 = math.exp %87 : vector<8x1xf32>
    %89 = arith.subf %85, %86 : vector<8x1xf32>
    %90 = math.exp %89 : vector<8x1xf32>
    %91 = arith.addf %88, %90 : vector<8x1xf32>
    %92 = math.log %91 : vector<8x1xf32>
    %93 = arith.addf %86, %92 : vector<8x1xf32>
    %94 = arith.select %24, %85, %77 : vector<8x1xi1>, vector<8x1xf32>
    %95 = arith.subf %93, %94 : vector<8x1xf32>
    %96 = vector.shape_cast %95 : vector<8x1xf32> to vector<1x8x1xf32>
    %cst_33 = arith.constant dense<0.000000e+00> : vector<1xf32>
    %97 = vector.multi_reduction <add>, %96, %cst_33 [1, 2] : vector<1x8x1xf32> to vector<1xf32>
    %98 = vector.shape_cast %97 : vector<1xf32> to vector<1x1x1xf32>
    %99 = vector.extract %98[0, 0, 0] : f32 from vector<1x1x1xf32>
    %cst_34 = arith.constant 0.699999988 : f32
    %100 = arith.mulf %cst_34, %99 : f32
    %cst_35 = arith.constant 8.000000e+00 : f32
    %101 = arith.divf %100, %cst_35 : f32
    %102 = arith.mulf %93, %93 : vector<8x1xf32>
    %103 = vector.shape_cast %102 : vector<8x1xf32> to vector<1x8x1xf32>
    %cst_36 = arith.constant dense<0.000000e+00> : vector<1xf32>
    %104 = vector.multi_reduction <add>, %103, %cst_36 [1, 2] : vector<1x8x1xf32> to vector<1xf32>
    %105 = vector.shape_cast %104 : vector<1xf32> to vector<1x1x1xf32>
    %106 = vector.extract %105[0, 0, 0] : f32 from vector<1x1x1xf32>
    %cst_37 = arith.constant 9.99999974E-5 : f32
    %107 = arith.mulf %cst_37, %106 : f32
    %cst_38 = arith.constant 8.000000e+00 : f32
    %108 = arith.divf %107, %cst_38 : f32
    %109 = arith.cmpf ogt, %85, %77 : vector<8x1xf32>
    %110 = arith.extui %109 : vector<8x1xi1> to vector<8x1xi32>
    %111 = arith.sitofp %110 : vector<8x1xi32> to vector<8x1xf32>
    %112 = vector.shape_cast %111 : vector<8x1xf32> to vector<1x8x1xf32>
    %cst_39 = arith.constant dense<0.000000e+00> : vector<1xf32>
    %113 = vector.multi_reduction <add>, %112, %cst_39 [1, 2] : vector<1x8x1xf32> to vector<1xf32>
    %114 = vector.shape_cast %113 : vector<1xf32> to vector<1x1x1xf32>
    %115 = vector.extract %114[0, 0, 0] : f32 from vector<1x1x1xf32>
    %cst_40 = arith.constant 8.000000e+00 : f32
    %116 = arith.divf %115, %cst_40 : f32
    %cst_41 = arith.constant 1.000000e+00 : f32
    %117 = arith.subf %cst_41, %116 : f32
    %cst_42 = arith.constant 5.000000e-01 : f32
    %118 = arith.subf %117, %cst_42 : f32
    %119 = arith.mulf %118, %118 : f32
    %cst_43 = arith.constant 5.000000e-01 : f32
    %120 = arith.subf %116, %cst_43 : f32
    %121 = arith.mulf %120, %120 : f32
    %122 = arith.addf %119, %121 : f32
    %cst_44 = arith.constant 5.000000e-02 : f32
    %123 = arith.mulf %cst_44, %122 : f32
    %124 = arith.addf %101, %108 : f32
    %125 = arith.addf %124, %123 : f32
    %c0_45 = arith.constant 0 : index
    %126 = memref.load %arg13[%c0_45] : memref<1xf32, #tpu.memory_space<smem>>
    memref.store %125, %arg13[%c0_45] : memref<1xf32, #tpu.memory_space<smem>>
    %127 = arith.subf %77, %93 : vector<8x1xf32>
    %128 = math.exp %127 : vector<8x1xf32>
    %129 = arith.subf %85, %93 : vector<8x1xf32>
    %130 = math.exp %129 : vector<8x1xf32>
    %131 = tpu.iota {dimensions = array<i32: 1>} : vector<8x4xi32>
    %c2_i32 = arith.constant 2 : i32
    %132 = vector.broadcast %c2_i32 : i32 to vector<8x4xi32>
    %133 = arith.cmpi slt, %131, %132 : vector<8x4xi32>
    %134 = vector.shape_cast %128 : vector<8x1xf32> to vector<8x1xf32>
    %135 = vector.broadcast %134 : vector<8x1xf32> to vector<8x4xf32>
    %136 = vector.shape_cast %130 : vector<8x1xf32> to vector<8x1xf32>
    %137 = vector.broadcast %136 : vector<8x1xf32> to vector<8x4xf32>
    %138 = arith.select %133, %135, %137 : vector<8x4xi1>, vector<8x4xf32>
    %c0_46 = arith.constant 0 : index
    %c0_47 = arith.constant 0 : index
    %139 = vector.load %arg12[%c0_46, %c0_47] : memref<8x4xf32, #tpu.memory_space<vmem>>, vector<8x4xf32>
    tpu.vector_store %arg12[%c0_46, %c0_47], %138 {strides = array<i32>} : memref<8x4xf32, #tpu.memory_space<vmem>>, vector<8x4xf32>,
    return
  }
}

</mosaic_0001>

<bundles_post_ra>
// kernel: interaction_module.1
= control target key start
LH: loop header
LB: loop body
LE: loop exit
PB: predicated region body
PF: predicated region fallthrough
CT: control target
= control target key end

     0   :  { %20 = vsyncpa [#allocation4], 0  ;;  %s956_s0 = inlined_call_operand.hbm [shape: f32[8,64], index: 0, kind: input, shape index: {}]   ;;  %s957_s1 = inlined_call_operand.hbm [shape: f32[8,64], index: 1, kind: input, shape index: {}]   ;;  %s958_s2 = inlined_call_operand.vmem [shape: f32[8,64], index: 2, kind: input, shape index: {}]   ;;  %s959_s3 = inlined_call_operand.hbm [shape: f32[8,64], index: 3, kind: input, shape index: {}]   ;;  %s960_s4 = inlined_call_operand.hbm [shape: f32[64,64], index: 4, kind: input, shape index: {}]   ;;  %s961_s5 = inlined_call_operand.vmem [shape: f32[1,64], index: 5, kind: input, shape index: {}]   ;;  %s962_s6 = inlined_call_operand.vmem [shape: f32[1,64], index: 6, kind: input, shape index: {}]   ;;  %s963_s7 = inlined_call_operand.<no memory space> [shape: f32[1], index: 7, kind: input, shape index: {}]   ;;  %s964_s8 = inlined_call_operand.hbm [shape: f32[64,64], index: 8, kind: input, shape index: {}]   ;;  %s965_s9 = inlined_call_operand.vmem [shape: f32[1,64], index: 9, kind: input, shape index: {}]   ;;  %s966_s10 = inlined_call_operand.vmem [shape: f32[2,64], index: 10, kind: input, shape index: {}]   ;;  %s967_s11 = inlined_call_operand.vmem [shape: f32[2], index: 11, kind: input, shape index: {}]   ;;  %s968_s12 = inlined_call_operand.vmem [shape: f32[8,4], index: 12, kind: output, shape index: {0}]   ;;  %s969_s13 = inlined_call_operand.hbm [shape: f32[1], index: 13, kind: output, shape index: {1}]  }
   0x1   :  { %21 = vsyncpa [#allocation8], 0 }
   0x2   :  { %22 = vsyncpa [#allocation11], 0 }
   0x3   :  { %23 = vsyncpa [#allocation6], 0 }
   0x4   :  { %24 = vsyncpa [#allocation5], 0  ;;  %s724_s25 = smov [#allocation7]   ;;  %s725_s27 = smov [#allocation10]  }
   0x5   :  { %s41_s26 = sshll.u32 %s724_s25, 4  ;;  %s62_s28 = sshll.u32 %s725_s27, 4  ;;  %s42_s26 = int_to_ptr.vmem [resolvable:$true] %s41_s26  ;;  %s805_s28 = int_to_ptr.vmem [resolvable:$true] %s62_s28 }
   0x6   :  { %s582_s14 = scalar_lea.hbm %s957_s1, 128 }
   0x7   :  { %p583_p0 = scmp.ne.s32.totalorder %s957_s1, %s582_s14  ;;  %p586_p1 = scmp.lt.u32.totalorder %s582_s14, %s957_s1 }
   0x9   :  { %p588_p2 = pnand %p586_p1, %p583_p0 }
   0xb   :  { %591 = shalt.err (!%p588_p2)
}
   0xc   :  { %s592_s19 = scalar_lea.vmem %s42_s26, 128  ;;  %p597_p4 = scmp.lt.s32.totalorder %s42_s26, %s42_s26 }
   0xd   :  { %p593_p3 = scmp.ne.s32.totalorder %s42_s26, %s592_s19  ;;  %p598_p5 = scmp.lt.s32.totalorder %s592_s19, %s592_s19 }
   0xf   :  { %p599_p6 = por %p598_p5, %p597_p4 }
  0x11   :  { %p600_p7 = pnand %p599_p6, %p593_p3 }
  0x13   :  { %603 = shalt.err (!%p600_p7)
}
  0x14   :  { %44 = dma.hbm_to_vmem [thread:$0]  %s957_s1, 128, %s42_s26, [#allocation8]  }
  0x15   :  { %s604_s24 = scalar_lea.hbm %s960_s4, 1024 }
  0x16   :  { %p605_p8 = scmp.ne.s32.totalorder %s960_s4, %s604_s24  ;;  %p608_p9 = scmp.lt.u32.totalorder %s604_s24, %s960_s4 }
  0x18   :  { %p610_p10 = pnand %p608_p9, %p605_p8 }
  0x1a   :  { %613 = shalt.err (!%p610_p10)
}
  0x1b   :  { %s614_s14 = scalar_lea.vmem %s805_s28, 1024  ;;  %p619_p12 = scmp.lt.s32.totalorder %s805_s28, %s805_s28 }
  0x1c   :  { %p615_p11 = scmp.ne.s32.totalorder %s805_s28, %s614_s14  ;;  %p620_p13 = scmp.lt.s32.totalorder %s614_s14, %s614_s14 }
  0x1e   :  { %p621_p0 = por %p620_p13, %p619_p12 }
  0x20   :  { %p622_p1 = pnand %p621_p0, %p615_p11 }
  0x22   :  { %625 = shalt.err (!%p622_p1)
}
  0x23   :  { %s726_s1 = smov 128   ;;  %s727_s26 = smov 8  }
  0x24   :  { %68 = dma.hbm_to_vmem [thread:$0]  %s960_s4, 1024, %s805_s28, [#allocation11], %s726_s1, %s726_s1, %s727_s26  }
  0x25   :  { %s728_s17 = smov [#allocation3]   ;;  %s729_s19 = smov [#allocation9]  }
  0x26   :  { %s31_s18 = sshll.u32 %s728_s17, 4  ;;  %s53_s20 = sshll.u32 %s729_s19, 4  ;;  %s32_s18 = int_to_ptr.vmem [resolvable:$true] %s31_s18  ;;  %s54_s20 = int_to_ptr.vmem [resolvable:$true] %s53_s20 }
  0x27   :  { %s626_s23 = scalar_lea.hbm %s956_s0, 128 }
  0x28   :  { %p627_p2 = scmp.ne.s32.totalorder %s956_s0, %s626_s23  ;;  %p630_p3 = scmp.lt.u32.totalorder %s626_s23, %s956_s0 }
  0x2a   :  { %p632_p4 = pnand %p630_p3, %p627_p2 }
  0x2c   :  { %635 = shalt.err (!%p632_p4)
}
  0x2d   :  { %s636_s4 = scalar_lea.vmem %s32_s18, 128  ;;  %p641_p6 = scmp.lt.s32.totalorder %s32_s18, %s32_s18 }
  0x2e   :  { %p637_p5 = scmp.ne.s32.totalorder %s32_s18, %s636_s4  ;;  %p642_p7 = scmp.lt.s32.totalorder %s636_s4, %s636_s4 }
  0x30   :  { %p643_p8 = por %p642_p7, %p641_p6 }
  0x32   :  { %p644_p9 = pnand %p643_p8, %p637_p5 }
  0x34   :  { %647 = shalt.err (!%p644_p9)
}
  0x35   :  { %34 = dma.hbm_to_vmem [thread:$0]  %s956_s0, 128, %s32_s18, [#allocation4]  }
  0x36   :  { %s648_s16 = scalar_lea.hbm %s959_s3, 128 }
  0x37   :  { %p649_p10 = scmp.ne.s32.totalorder %s959_s3, %s648_s16  ;;  %p652_p11 = scmp.lt.u32.totalorder %s648_s16, %s959_s3 }
  0x39   :  { %p654_p12 = pnand %p652_p11, %p649_p10 }
  0x3b   :  { %657 = shalt.err (!%p654_p12)
}
  0x3c   :  { %s658_s23 = scalar_lea.vmem %s54_s20, 128  ;;  %p663_p0 = scmp.lt.s32.totalorder %s54_s20, %s54_s20 }
  0x3d   :  { %p659_p13 = scmp.ne.s32.totalorder %s54_s20, %s658_s23  ;;  %p664_p1 = scmp.lt.s32.totalorder %s658_s23, %s658_s23 }
  0x3f   :  { %p665_p2 = por %p664_p1, %p663_p0 }
  0x41   :  { %p666_p3 = pnand %p665_p2, %p659_p13 }
  0x43   :  { %669 = shalt.err (!%p666_p3)
}
  0x44   :  { %56 = dma.hbm_to_vmem [thread:$0]  %s959_s3, 128, %s54_s20, [#allocation8]  }
  0x45   :  { %s97_s27 = sshll.u32 %s967_s11, 4  ;;  %s730_s29 = smov [#allocation12]   ;;  %s98_s27 = int_to_ptr.vmem [resolvable:$true] %s97_s27 }
  0x46   :  { %s80_s4 = sshll.u32 %s730_s29, 4  ;;  %s670_s14 = scalar_lea.hbm %s964_s8, 1024  ;;  %s81_s4 = int_to_ptr.vmem [resolvable:$true] %s80_s4 }
  0x47   :  { %p671_p4 = scmp.ne.s32.totalorder %s964_s8, %s670_s14  ;;  %p674_p5 = scmp.lt.u32.totalorder %s670_s14, %s964_s8 }
  0x49   :  { %p676_p6 = pnand %p674_p5, %p671_p4 }
  0x4b   :  { %679 = shalt.err (!%p676_p6)
}
  0x4c   :  { %s680_s3 = scalar_lea.vmem %s81_s4, 1024  ;;  %p685_p8 = scmp.lt.s32.totalorder %s81_s4, %s81_s4 }
  0x4d   :  { %p681_p7 = scmp.ne.s32.totalorder %s81_s4, %s680_s3  ;;  %p686_p9 = scmp.lt.s32.totalorder %s680_s3, %s680_s3 }
  0x4f   :  { %p687_p10 = por %p686_p9, %p685_p8 }
  0x51   :  { %p688_p11 = pnand %p687_p10, %p681_p7 }
  0x53   :  { %691 = shalt.err (!%p688_p11)
}
  0x54   :  { %86 = dma.hbm_to_vmem [thread:$0]  %s964_s8, 1024, %s81_s4, [#allocation11], %s726_s1, %s726_s1, %s727_s26  }
  0x55   :  { %s692_s21 = scalar_lea.vmem %s98_s27, 16  ;;  %p697_p13 = scmp.lt.s32.totalorder %s98_s27, %s98_s27 }
  0x56   :  { %p693_p12 = scmp.ne.s32.totalorder %s98_s27, %s692_s21  ;;  %p698_p0 = scmp.lt.s32.totalorder %s692_s21, %s692_s21 }
  0x58   :  { %p699_p1 = por %p698_p0, %p697_p13 }
  0x5a   :  { %p700_p2 = pnand %p699_p1, %p693_p12 }
  0x5c   :  { %703 = shalt.err (!%p700_p2)
}
  0x5d   :  { %s731_s22 = smov [#allocation13]  }
  0x5e   :  { %100 = dma.vmem_to_smem %s98_s27, 16, %s731_s22, [#allocation6]  }
  0x5f   :  { %714 = dma.done.wait [#allocation4], 128  }
  0x60   :  { %715 = vsyncadd [#allocation4], 4294967168 }
  0x61   :  { %716 = dma.done.wait [#allocation8], 256  }
  0x62   :  { %717 = vsyncadd [#allocation8], 4294967040 }
  0x63   :  { %718 = dma.done.wait [#allocation11], 2048  }
  0x64   :  { %719 = vsyncadd [#allocation11], 4294965248 }
  0x65   :  { %720 = dma.done.wait [#allocation6], 16  }
  0x66   :  { %721 = vsyncadd [#allocation6], 4294967280 }
  0x67   :  { %119 = sfence }
  0x68   :  { %v145_v0 = vld [vmem:[#allocation10] sm:$0xff]  ;;  %v146_v1 = vld [vmem:[#allocation10 + $0x8] sm:$0xff]  ;;  %v147_v2 = vld [vmem:[#allocation10 + $0x10] sm:$0xff]  ;;  %vm126_vm0 = vcmask 523264   ;;  %v732_v59 = vmov 0.0   ;;  %vm733_vm1 = vmmov 0  }
  0x69   :  { %v153_v3 = vpack.c.bf16 %v146_v1, %v145_v0  ;;  %v148_v4 = vld [vmem:[#allocation10 + $0x18] sm:$0xff]  ;;  %v149_v6 = vld [vmem:[#allocation10 + $0x20] sm:$0xff]  ;;  %v150_v7 = vld [vmem:[#allocation10 + $0x28] sm:$0xff]  ;;  %519 = vmatprep.subr.bf16.mxu1 %v732_v59  ;;  %527 = vmatprep.mubr.msk.bf16.mxu1 %vm733_vm1, %v732_v59  ;;  %s364_s25 = sld [smem:[#allocation13]]  ;;  %vm391_vm4 = vcmask 7168   ;;  %vm458_vm6 = vcmask 31744  }
  0x6a   :  { %v154_v5 = vpack.c.bf16 %v148_v4, %v147_v2  ;;  %v881_v8 = vld [vmem:[#allocation3] sm:$0xff]  ;;  %v883_v9 = vld [vmem:[#allocation7] sm:$0xff]  ;;  %v155_v11 = vpack.c.bf16 %v150_v7, %v149_v6  ;;  %v152_v13 = vld [vmem:[#allocation10 + $0x38] sm:$0xff] }
  0x6b   :  { %507 = vmatprep.subr.bf16.mxu0 %v153_v3  ;;  %v157_v10 = vpack.c.bf16 %v883_v9, %v881_v8  ;;  %v151_v12 = vld [vmem:[#allocation10 + $0x30] sm:$0xff]  ;;  %v891_v15 = vld [vmem:[%s958_s2] sm:$0xff]  ;;  %v893_v16 = vld [vmem:[#allocation9] sm:$0xff] }
  0x6c   :  { %508 = vmatpush3.bf16.msra.mxu0 %v153_v3  ;;  %v156_v14 = vpack.c.bf16 %v152_v13, %v151_v12  ;;  %v158_v17 = vpack.c.bf16 %v893_v16, %v891_v15  ;;  %v481_v18 = vld [vmem:[%s961_s5] ss:$0 sm:$0xff]  ;;  %v285_v56 = vld [vmem:[#allocation12] sm:$0xff]  ;;  %v287_v60 = vld [vmem:[#allocation12 + $0x10] sm:$0xff]  ;;  %v125_v6 = vmul.f32 %v891_v15, %v891_v15  ;;  %v273_v12 = vstv %s963_s7  ;;  %s704_s5 = scalar_lea.hbm %s969_s13, 16 }
  0x6d   :  { %509 = vmatprep.subr.bf16.mxu0 %v154_v5  ;;  %515 = vmatprep.mubr.msk.bf16.mxu0 %vm126_vm0, %v157_v10  ;;  %v488_v40 = vld [vmem:[%s962_s6] ss:$0 sm:$0xff]  ;;  %v288_v61 = vld [vmem:[#allocation12 + $0x18] sm:$0xff]  ;;  %v289_v63 = vld [vmem:[#allocation12 + $0x20] sm:$0xff]  ;;  %p705_p3 = scmp.ne.s32.totalorder %s969_s13, %s704_s5  ;;  %p708_p4 = scmp.lt.u32.totalorder %s704_s5, %s969_s13 }
  0x6e   :  { %v286_v57 = vld [vmem:[#allocation12 + $0x8] sm:$0xff]  ;;  %v294_v62 = vpack.c.bf16 %v288_v61, %v287_v60  ;;  %v291_v2 = vld [vmem:[#allocation12 + $0x30] sm:$0xff]  ;;  %v292_v3 = vld [vmem:[#allocation12 + $0x38] sm:$0xff]  ;;  %v127_v10 = vsel %vm126_vm0, %v125_v6, 0.0 }
  0x6f   :  { %v293_v58 = vpack.c.bf16 %v286_v57, %v285_v56  ;;  %v290_v0 = vld [vmem:[#allocation12 + $0x28] sm:$0xff]  ;;  %v296_v4 = vpack.c.bf16 %v292_v3, %v291_v2  ;;  %p710_p5 = pnand %p708_p4, %p705_p3 }
  0x70   :  { %510 = vmatpush3.bf16.msra.mxu0 %v154_v5  ;;  %v295_v1 = vpack.c.bf16 %v290_v0, %v289_v63  ;;  %v133_v5 = vmul.f32 %v893_v16, %v893_v16 }
  0x71   :  { %511 = vmatprep.subr.bf16.mxu0 %v155_v11  ;;  %520 = vmatpush3.bf16.msra.mxu1 %v293_v58 }
  0x72   :  { %521 = vmatprep.subr.bf16.mxu1 %v732_v59  ;;  %v134_v7 = vsel %vm126_vm0, %v133_v5, 0.0 }
  0x74   :  { %512 = vmatpush3.bf16.msra.mxu0 %v155_v11 }
  0x75   :  { %513 = vmatprep.subr.bf16.mxu0 %v156_v14  ;;  %522 = vmatpush3.bf16.msra.mxu1 %v294_v62 }
  0x76   :  { %523 = vmatprep.subr.bf16.mxu1 %v732_v59 }
  0x78   :  { %514 = vmatpush3.bf16.msra.mxu0 %v156_v14 }
  0x79   :  { %524 = vmatpush3.bf16.msra.mxu1 %v295_v1 }
  0x7a   :  { %525 = vmatprep.subr.bf16.mxu1 %v732_v59 }
  0x7b   :  { %516 = vmatmul.mubr.msk.bf16.vlgmr.msra.gmra.mrb[0].mxu0 %vm126_vm0, %v158_v17 }
  0x7d   :  { %526 = vmatpush3.bf16.msra.mxu1 %v296_v4 }
 0x14e   :  { %v517_v19 = vpop.f32.mrb[0].mxu0 }
 0x14f   :  { %v215_v20 = vadd.f32 %v517_v19, %v481_v18  ;;  %v206_v21 = vpop.f32.mrb[1].mxu0 }
 0x150   :  { %v207_v22 = vadd.f32 %v481_v18, %v206_v21  ;;  %v518_v23 = vpop.f32.mrb[2].mxu0 }
 0x151   :  { %v486_v24 = vmul.f32 -1.442695, %v215_v20  ;;  %v218_v25 = vadd.f32 %v518_v23, %v481_v18  ;;  %v209_v26 = vpop.f32.mrb[3].mxu0 }
 0x152   :  { %v484_v27 = vmul.f32 -1.442695, %v207_v22  ;;  %v210_v28 = vadd.f32 %v481_v18, %v209_v26 }
 0x153   :  { %548 = vpow2.f32 %v486_v24  ;;  %v487_v29 = vmul.f32 -1.442695, %v218_v25 }
 0x154   :  { %550 = vpow2.f32 %v484_v27  ;;  %v485_v30 = vmul.f32 -1.442695, %v210_v28 }
 0x155   :  { %552 = vpow2.f32 %v487_v29 }
 0x156   :  { %554 = vpow2.f32 %v485_v30  ;;  %v489_v30 = vld [vmem:[%s965_s9] ss:$0 sm:$0xff] }
 0x15d   :  { %v549_v31 = vpop.eup %548 }
 0x15e   :  { %v551_v32 = vpop.eup %550  ;;  %v235_v33 = vadd.f32 1.0, %v549_v31 }
 0x15f   :  { %v553_v34 = vpop.eup %552  ;;  %v233_v35 = vadd.f32 1.0, %v551_v32 }
 0x160   :  { %v555_v36 = vpop.eup %554  ;;  %556 = vrcp.f32 %v235_v33  ;;  %v236_v37 = vadd.f32 1.0, %v553_v34 }
 0x161   :  { %558 = vrcp.f32 %v233_v35  ;;  %v234_v38 = vadd.f32 1.0, %v555_v36 }
 0x162   :  { %560 = vrcp.f32 %v236_v37 }
 0x163   :  { %562 = vrcp.f32 %v234_v38 }
 0x16a   :  { %v557_v39 = vpop.eup %556 }
 0x16b   :  { %v559_v41 = vpop.eup %558  ;;  %v247_v42 = vmul.f32 %v557_v39, %v215_v20 }
 0x16c   :  { %v561_v43 = vpop.eup %560  ;;  %v245_v44 = vmul.f32 %v559_v41, %v207_v22 }
 0x16d   :  { %v563_v45 = vpop.eup %562  ;;  %v248_v46 = vmul.f32 %v561_v43, %v218_v25  ;;  %v258_v47 = vmul.f32 %v488_v40, %v247_v42 }
 0x16e   :  { %v246_v48 = vmul.f32 %v563_v45, %v210_v28  ;;  %v256_v49 = vmul.f32 %v488_v40, %v245_v44 }
 0x16f   :  { %v266_v50 = vsel %vm126_vm0, %v258_v47, 0.0  ;;  %v259_v51 = vmul.f32 %v488_v40, %v248_v46  ;;  %v355_v47 = vld [vmem:[%s966_s10] sm:$0x3]  ;;  %s492_s10 = sld [smem:[#allocation13 + $0x1]] }
 0x170   :  { %267 = vadd.xlane.f32.xlu1 %v266_v50  ;;  %v260_v52 = vsel %vm126_vm0, %v256_v49, 0.0  ;;  %v257_v53 = vmul.f32 %v488_v40, %v246_v48  ;;  %v356_v40 = vlaneseq }
 0x171   :  { %261 = vadd.xlane.f32.xlu0 %v260_v52  ;;  %v269_v54 = vsel %vm126_vm0, %v259_v51, 0.0 }
 0x172   :  { %v263_v55 = vsel %vm126_vm0, %v257_v53, 0.0  ;;  %v357_v42 = vshrl.u32 %v356_v40, 7 }
 0x174   :  { %270 = vadd.xlane.f32.xlu1 %v269_v54  ;;  %v369_v44 = vsub.s32 1, %v357_v42  ;;  %v358_v45 = vsub.s32 0, %v357_v42 }
 0x175   :  { %264 = vadd.xlane.f32.xlu0 %v263_v55  ;;  %v376_v61 = vstv %s492_s10 }
 0x176   :  { %v370_v48 = vrot.slane %v355_v47, %v369_v44  ;;  %v359_v49 = vrot.slane %v355_v47, %v358_v45 }
 0x178   :  { %135 = vadd.xlane.f32.xlu1 %v134_v7 }
 0x179   :  { %128 = vadd.xlane.f32.xlu0 %v127_v10 }
 0x1fd   :  { %v268_v11 = vpop.xlane.xlu1 %267 }
 0x1fe   :  { %v262_v13 = vpop.xlane.xlu0 %261  ;;  %v276_v19 = vadd.f32 %v273_v12, %v268_v11 }
 0x1ff   :  { %v274_v14 = vadd.f32 %v273_v12, %v262_v13 }
 0x200   :  { %v280_v24 = vmul.f32 %v276_v19, %v891_v15 }
 0x201   :  { %v271_v17 = vpop.xlane.xlu1 %270  ;;  %v278_v21 = vmul.f32 %v274_v14, %v881_v8 }
 0x202   :  { %v265_v18 = vpop.xlane.xlu0 %264  ;;  %v277_v22 = vadd.f32 %v273_v12, %v271_v17 }
 0x203   :  { %v275_v20 = vadd.f32 %v273_v12, %v265_v18 }
 0x204   :  { %v281_v26 = vmul.f32 %v277_v22, %v893_v16 }
 0x205   :  { %v279_v23 = vmul.f32 %v275_v20, %v883_v9  ;;  %v136_v35 = vpop.xlane.xlu1 %135 }
 0x206   :  { %v129_v36 = vpop.xlane.xlu0 %128  ;;  %v137_v37 = vmax.f32 %v136_v35, 1e-12 }
 0x207   :  { %v282_v25 = vadd.f32 %v279_v23, %v278_v21  ;;  %v130_v38 = vmax.f32 %v129_v36, 1e-12 }
 0x209   :  { %v283_v27 = vadd.f32 %v282_v25, %v280_v24 }
 0x20b   :  { %v284_v28 = vadd.f32 %v283_v27, %v281_v26 }
 0x20d   :  { %v297_v29 = vpack.c.bf16 %v284_v28, %v284_v28  ;;  %v455_v28 = vand.u32 127, %v356_v40 }
 0x20f   :  { %528 = vmatmul.mubr.msk.bf16.vlgmr.msra.gmra.mrb[0].mxu1 %vm126_vm0, %v297_v29  ;;  %vm456_vm5 = vcmp.lt.s32.totalorder %v455_v28, 2 }
 0x2e2   :  { %v342_v31 = vpop.f32.mrb[0].mxu1 }
 0x2e3   :  { %v343_v32 = vadd.f32 %v489_v30, %v342_v31  ;;  %v529_v8 = vpop.f32.mrb[1].mxu1 }
 0x2e4   :  { %v345_v33 = vpop.f32.mrb[2].mxu1 }
 0x2e5   :  { %v491_v34 = vmul.f32 -1.442695, %v343_v32  ;;  %v530_v9 = vpop.f32.mrb[3].mxu1 }
 0x2e7   :  { %564 = vpow2.f32 %v491_v34 }
 0x2e8   :  { %566 = vrsqrt.f32 %v137_v37 }
 0x2e9   :  { %568 = vrsqrt.f32 %v130_v38 }
 0x2f1   :  { %v565_v39 = vpop.eup %564 }
 0x2f2   :  { %v351_v41 = vadd.f32 1.0, %v565_v39  ;;  %v567_v43 = vpop.eup %566 }
 0x2f3   :  { %v569_v46 = vpop.eup %568  ;;  %v139_v51 = vmul.f32 %v567_v43, %v893_v16 }
 0x2f4   :  { %570 = vrcp.f32 %v351_v41  ;;  %v132_v50 = vmul.f32 %v569_v46, %v891_v15  ;;  %v365_v15 = vstv %s364_s25 }
 0x2f6   :  { %v140_v56 = vmul.f32 %v139_v51, %v132_v50 }
 0x2f8   :  { %v141_v60 = vsel %vm126_vm0, %v140_v56, 0.0 }
 0x2fe   :  { %v571_v52 = vpop.eup %570 }
 0x2ff   :  { %v354_v53 = vmul.f32 %v571_v52, %v343_v32 }
 0x301   :  { %v371_v54 = vmul.f32 %v370_v48, %v354_v53  ;;  %v360_v55 = vmul.f32 %v359_v49, %v354_v53 }
 0x303   :  { %v372_v57 = vsel %vm126_vm0, %v371_v54, 0.0  ;;  %v361_v58 = vsel %vm126_vm0, %v360_v55, 0.0 }
 0x304   :  { %373 = vadd.xlane.f32.xlu1 %v372_v57  ;;  %362 = vadd.xlane.f32.xlu0 %v361_v58 }
 0x308   :  { %142 = vadd.xlane.f32.xlu0 %v141_v60 }
 0x391   :  { %v374_v62 = vpop.xlane.xlu1 %373  ;;  %v363_v16 = vpop.xlane.xlu0 %362 }
 0x392   :  { %v377_v63 = vadd.f32 %v376_v61, %v374_v62  ;;  %v366_v0 = vadd.f32 %v365_v15, %v363_v16 }
 0x394   :  { %v378_v1 = vmax.f32 %v366_v0, %v377_v63  ;;  %vm421_vm3 = vcmp.gt.f32.partialorder %v377_v63, %v366_v0 }
 0x395   :  { %v143_v11 = vpop.xlane.xlu0 %142  ;;  %v493_v26 = vsel %vm421_vm3, 1.0, %v732_v59 }
 0x396   :  { %v379_v2 = vsub.f32 %v366_v0, %v378_v1  ;;  %v382_v3 = vsub.f32 %v377_v63, %v378_v1  ;;  %vm144_vm2 = vcmp.gt.f32.partialorder %v143_v11, 0.3  ;;  %v424_v27 = vsel %vm391_vm4, %v493_v26, 0.0 }
 0x397   :  { %v389_v17 = vsel %vm144_vm2, %v377_v63, %v366_v0 }
 0x398   :  { %v380_v4 = vmul.f32 1.442695, %v379_v2  ;;  %v383_v5 = vmul.f32 1.442695, %v382_v3 }
 0x39a   :  { %572 = vpow2.f32 %v380_v4 }
 0x39b   :  { %574 = vpow2.f32 %v383_v5 }
 0x3a4   :  { %v573_v6 = vpop.eup %572 }
 0x3a5   :  { %v575_v7 = vpop.eup %574 }
 0x3a6   :  { %v385_v10 = vadd.f32 %v575_v7, %v573_v6 }
 0x3a8   :  { %576 = vlog2.f32 %v385_v10 }
 0x3b2   :  { %v577_v12 = vpop.eup %576 }
 0x3b3   :  { %v387_v13 = vmul.f32 0.6931472, %v577_v12 }
 0x3b5   :  { %v388_v14 = vadd.f32 %v387_v13, %v378_v1 }
 0x3b7   :  { %v406_v18 = vmul.f32 %v388_v14, %v388_v14  ;;  %v448_v19 = vsub.f32 %v366_v0, %v388_v14  ;;  %v451_v20 = vsub.f32 %v377_v63, %v388_v14  ;;  %v390_v21 = vsub.f32 %v388_v14, %v389_v17 }
 0x3b9   :  { %v407_v22 = vsel %vm391_vm4, %v406_v18, 0.0  ;;  %v449_v23 = vmul.f32 1.442695, %v448_v19  ;;  %v452_v24 = vmul.f32 1.442695, %v451_v20  ;;  %v392_v25 = vsel %vm391_vm4, %v390_v21, 0.0 }
 0x3ba   :  { %408 = vadd.xlane.f32.xlu0 %v407_v22  ;;  %393 = vadd.xlane.f32.xlu1 %v392_v25 }
 0x3bb   :  { %578 = vpow2.f32 %v449_v23 }
 0x3bc   :  { %580 = vpow2.f32 %v452_v24 }
 0x3be   :  { %425 = vadd.xlane.f32.xlu1 %v424_v27 }
 0x3c5   :  { %v579_v29 = vpop.eup %578 }
 0x3c6   :  { %v581_v30 = vpop.eup %580 }
 0x3c7   :  { %v457_v31 = vsel %vm456_vm5, %v579_v29, %v581_v30 }
 0x3c8   :  { %459 = vst.msk [vmem:[%s968_s12] sm:$0xff] %vm458_vm6, %v457_v31 }
 0x447   :  { %v394_v32 = vpop.xlane.xlu1 %393  ;;  %v409_v8 = vpop.xlane.xlu0 %408 }
 0x448   :  { %v395_v33 = vrot.slane %v394_v32, 4  ;;  %v410_v34 = vrot.slane %v409_v8, 4 }
 0x44a   :  { %v396_v59 = vadd.f32 %v395_v33, %v394_v32  ;;  %v411_v9 = vadd.f32 %v410_v34, %v409_v8 }
 0x44b   :  { %v426_v35 = vpop.xlane.xlu1 %425 }
 0x44c   :  { %v397_v36 = vrot.slane %v396_v59, 2  ;;  %v412_v37 = vrot.slane %v411_v9, 2  ;;  %v427_v38 = vrot.slane %v426_v35, 4 }
 0x44e   :  { %v413_v39 = vadd.f32 %v412_v37, %v411_v9  ;;  %v428_v40 = vadd.f32 %v427_v38, %v426_v35  ;;  %v398_v41 = vadd.f32 %v397_v36, %v396_v59 }
 0x450   :  { %v429_v42 = vrot.slane %v428_v40, 2  ;;  %v399_v43 = vrot.slane %v398_v41, 1  ;;  %v414_v44 = vrot.slane %v413_v39, 1 }
 0x452   :  { %v430_v45 = vadd.f32 %v429_v42, %v428_v40  ;;  %v400_v46 = vadd.f32 %v399_v43, %v398_v41  ;;  %v415_v47 = vadd.f32 %v414_v44, %v413_v39 }
 0x454   :  { %531 = vpush %v400_v46  ;;  %v431_v48 = vrot.slane %v430_v45, 1 }
 0x455   :  { %533 = vpush %v415_v47 }
 0x456   :  { %v432_v49 = vadd.f32 %v431_v48, %v430_v45 }
 0x458   :  { %535 = vpush %v432_v49 }
 0x485   :  { %s532_s12 = spop %531 }
 0x486   :  { %s534_s4 = spop %533  ;;  %s402_s28 = smul.f32 0.7, %s532_s12 }
 0x487   :  { %s417_s30 = smul.f32 0.0001, %s534_s4 }
 0x488   :  { %s405_s17 = smul.f32 0.125, %s402_s28 }
 0x489   :  { %s536_s14 = spop %535  ;;  %s420_s3 = smul.f32 0.125, %s417_s30 }
 0x48a   :  { %s436_s15 = smul.f32 0.125, %s536_s14 }
 0x48b   :  { %s444_s1 = sadd.f32 %s420_s3, %s405_s17 }
 0x48c   :  { %s437_s16 = ssub.f32 1.0, %s436_s15 }
 0x48d   :  { %s495_s19 = sadd.f32 -0.5, %s436_s15 }
 0x48e   :  { %s494_s11 = sadd.f32 -0.5, %s437_s16 }
 0x48f   :  { %s441_s20 = smul.f32 %s495_s19, %s495_s19 }
 0x490   :  { %s439_s21 = smul.f32 %s494_s11, %s494_s11 }
 0x492   :  { %s442_s22 = sadd.f32 %s441_s20, %s439_s21 }
 0x494   :  { %s443_s8 = smul.f32 0.05, %s442_s22 }
 0x496   :  { %s445_s26 = sadd.f32 %s444_s1, %s443_s8 }
 0x498   :  { %447 = sst [smem:[#allocation14]] %s445_s26 }
 0x499   :  { %713 = shalt.err (!%p710_p5)
}
 0x49a   :  { %s734_s9 = smov [#allocation14]  }
 0x49b   :  { %469 = dma.smem_to_hbm %s734_s9, 16, %s969_s13, [#allocation5]  }
 0x49c   :  { %722 = dma.done.wait [#allocation5], 16  }
 0x49d   :  { %723 = vsyncadd [#allocation5], 4294967280 }
 0x49e   :  { %475 = sfence }
 0x49f   :  { %476 = vsyncpa [#allocation4], 1 }
 0x4a0   :  { %477 = vsyncpa [#allocation8], 1 }
 0x4a1   :  { %478 = vsyncpa [#allocation11], 1 }
 0x4a2   :  { %479 = vsyncpa [#allocation5], 1 }
 0x4a3   :  { %480 = vsyncpa [#allocation6], 1 }

</bundles_post_ra>
